<compile_context>
chip_gen: v5e
topology: v5e:2x2
jax: 0.10.0
libtpu: 0.0.40
codegen_flags: <defaults>
</compile_context>

<pallas_src>
import functools

import jax
import jax.numpy as jnp
from jax import lax
from jax.experimental import pallas as pl
from jax.experimental.pallas import tpu as pltpu


def _round_up(x, m):
    return ((x + m - 1) // m) * m


def _distill_kl_kernel(params_ref, ys_ref, yt_ref, loss_ref, acc_ref, *,
                       n_valid, tile_n, ragged, approx):
    step = pl.program_id(0)
    inv_t = params_ref[0]     # 1 / T
    scale = params_ref[1]     # T^2 / N

    ys = ys_ref[...].astype(jnp.float32)
    yt = yt_ref[...].astype(jnp.float32)

    # Student log-softmax pieces: log_ps = zs - log(ss).  The 1/T scale is applied
    # after the max subtraction (max(x/T) == max(x)/T for T > 0).
    ms = jnp.max(ys, axis=1, keepdims=True)
    zs = (ys - ms) * inv_t
    ss = jnp.sum(jnp.exp(zs), axis=1, keepdims=True)

    # Teacher softmax pieces: p_t = et / st, log_pt = zt - log(st).
    mt = jnp.max(yt, axis=1, keepdims=True)
    zt = (yt - mt) * inv_t
    et = jnp.exp(zt)
    st = jnp.sum(et, axis=1, keepdims=True)

    # Per-row KL contribution, using sum_j p_t = 1:
    #   sum_j p_t (log_pt - log_ps) = (1/st) * sum_j et*(zt - zs) + log(ss) - log(st)
    num = jnp.sum(et * (zt - zs), axis=1, keepdims=True)
    row = num * pl.reciprocal(st, approx=approx) + (jnp.log(ss) - jnp.log(st))

    if ragged:
        # Last tile extends past N: rows >= N read undefined VMEM; zero them out.
        # Garbage stays row-local (all reductions above are per-row), so masking
        # the (tile_n, 1) result vector is sufficient and cheap.
        rid = step * tile_n + lax.broadcasted_iota(jnp.int32, (tile_n, 1), 0)
        row = jnp.where(rid < n_valid, row, jnp.float32(0.0))

    @pl.when(step == 0)
    def _init():
        acc_ref[...] = jnp.zeros_like(acc_ref)

    acc_ref[...] += row   # pure VPU vreg adds; no per-step cross-lane reduce

    @pl.when(step == pl.num_programs(0) - 1)
    def _finalize():
        loss_ref[0, 0] = jnp.sum(acc_ref[...]) * scale


def _vmem_budget():
    """(tile byte budget, vmem_limit_bytes), generation-aware."""
    cap = 0
    try:
        cap = int(getattr(pltpu.get_tpu_info(), "vmem_capacity_bytes", 0))
    except Exception:
        cap = 0
    if cap >= 96 * 1024 * 1024:            # v5e / v6e: 128 MiB physical VMEM
        return 48 * 1024 * 1024, 64 * 1024 * 1024
    # v7x (64 MiB per TC) or unknown: stay conservative.
    return 20 * 1024 * 1024, 32 * 1024 * 1024


def _choose_tile_n(n, c, in_itemsize, budget_bytes):
    # Peak VMEM per batch row: 2 inputs x 2 pipeline buffers (input dtype) plus
    # ~6 live f32 full-tile temporaries inside the body.
    per_row = c * (4 * in_itemsize + 6 * 4)
    t = max(16, budget_bytes // per_row)
    if t >= n:
        return n, 1                        # single full-extent block, no row mask
    t = max(16, (int(t) // 16) * 16)       # bf16 packs 16 rows per vreg (sublanes)
    num_tiles = -(-n // t)
    # Re-balance so the last (masked) tile isn't pathologically small.
    tile_n = _round_up(-(-n // num_tiles), 16)
    num_tiles = -(-n // tile_n)
    return tile_n, num_tiles


def distill_kl(y_s, y_t, T, *, tile_n=None, approx=False, to_bf16=False):
    """Pallas-backed DistillKL forward.  y_s, y_t: (N, C) logits (f32 or bf16)."""
    assert y_s.shape == y_t.shape and y_s.ndim == 2, (y_s.shape, y_t.shape)
    n, c = y_s.shape

    if to_bf16 and y_s.dtype != jnp.bfloat16:
        # Fast path: halves HBM read traffic (best when the producer already
        # emits bf16 so XLA fuses the cast); softmax math stays f32 in-kernel.
        y_s = y_s.astype(jnp.bfloat16)
        y_t = y_t.astype(jnp.bfloat16)

    itemsize = max(jnp.dtype(y_s.dtype).itemsize, jnp.dtype(y_t.dtype).itemsize)
    budget_bytes, vmem_limit = _vmem_budget()

    if tile_n is None:
        tile_n, num_tiles = _choose_tile_n(n, c, itemsize, budget_bytes)
    else:
        tile_n = max(16, (int(tile_n) // 16) * 16)
        if tile_n >= n:
            tile_n, num_tiles = n, 1
        else:
            num_tiles = -(-n // tile_n)
    ragged = (tile_n * num_tiles != n)

    # Runtime scalars (SMEM): no recompile when T changes across calls.
    t_val = jnp.asarray(T, dtype=jnp.float32)
    params = jnp.stack([1.0 / t_val, (t_val * t_val) / jnp.float32(n)])

    kernel = functools.partial(
        _distill_kl_kernel,
        n_valid=n, tile_n=tile_n, ragged=ragged, approx=bool(approx))

    out = pl.pallas_call(
        kernel,
        out_shape=jax.ShapeDtypeStruct((1, 1), jnp.float32),
        grid=(num_tiles,),
        in_specs=[
            pl.BlockSpec(memory_space=pltpu.MemorySpace.SMEM),   # (inv_t, scale)
            pl.BlockSpec((tile_n, c), lambda i: (i, 0)),         # student logits
            pl.BlockSpec((tile_n, c), lambda i: (i, 0)),         # teacher logits
        ],
        out_specs=pl.BlockSpec((1, 1), lambda i: (0, 0),
                               memory_space=pltpu.MemorySpace.SMEM),
        scratch_shapes=[pltpu.VMEM((tile_n, 1), jnp.float32)],
        compiler_params=pltpu.CompilerParams(
            # The grid axis carries the accumulator -> must stay sequential.
            dimension_semantics=("arbitrary",),
            vmem_limit_bytes=vmem_limit,
        ),
    )(params, y_s, y_t)
    return out[0, 0]


def _distill_kl_ref(y_s, y_t, T):
    """Pure-JAX reference for sanity checking."""
    y_s = y_s.astype(jnp.float32)
    y_t = y_t.astype(jnp.float32)
    log_ps = jax.nn.log_softmax(y_s / T, axis=1)
    p_t = jax.nn.softmax(y_t / T, axis=1)
    log_pt = jax.nn.log_softmax(y_t / T, axis=1)
    kl = jnp.sum(p_t * (log_pt - log_ps))
    return kl * (T ** 2) / y_s.shape[0]


if __name__ == "__main__":
    key = jax.random.PRNGKey(0)
    k1, k2, k3, k4 = jax.random.split(key, 4)

    # --- Case 1: f32 logits, C not a multiple of 128 (full-extent class block,
    #     single grid step), exact per-row reciprocal (default).
    T = 4.0
    N, C = 16, 100
    y_s = jax.random.normal(k1, (N, C), dtype=jnp.float32)
    y_t = jax.random.normal(k2, (N, C), dtype=jnp.float32)
    ref = jax.block_until_ready(_distill_kl_ref(y_s, y_t, T))
    loss = jax.block_until_ready(distill_kl(y_s, y_t, T))
    assert jnp.allclose(loss, ref, rtol=1e-4, atol=1e-5), (loss, ref)

    # --- Case 2: bf16 logits, ragged N (50 rows, forced tile_n=16 -> 4 grid steps
    #     with a masked last tile), approximate EUP reciprocal fast path.
    T2 = 2.0
    N2, C2 = 50, 160
    y_s2 = jax.random.normal(k3, (N2, C2), dtype=jnp.float32).astype(jnp.bfloat16)
    y_t2 = jax.random.normal(k4, (N2, C2), dtype=jnp.float32).astype(jnp.bfloat16)
    ref2 = jax.block_until_ready(_distill_kl_ref(y_s2, y_t2, T2))
    loss2 = jax.block_until_ready(distill_kl(y_s2, y_t2, T2, tile_n=16, approx=True))
    assert jnp.allclose(loss2, ref2, rtol=5e-3, atol=1e-4), (loss2, ref2)

    print("KERNEL_OK")
</pallas_src>

<mosaic_0001>
module attributes {stable_mosaic.version = 11 : i64} {
  func.func @_distill_kl_kernel(%arg0: i32, %arg1: memref<2xf32, #tpu.memory_space<smem>>, %arg2: memref<16x100xf32, #tpu.memory_space<vmem>>, %arg3: memref<16x100xf32, #tpu.memory_space<vmem>>, %arg4: memref<1x1xf32, #tpu.memory_space<smem>>, %arg5: memref<16x1xf32, #tpu.memory_space<vmem>>) attributes {dimension_semantics = [#tpu.dimension_semantics<arbitrary>], iteration_bounds = array<i64: 1>, scalar_prefetch = 0 : i64, scratch_operands = 1 : i64, tpu.core_type = #tpu.core_type<tc>, window_params = [{transform_indices = @transform_0, window_bounds = array<i64: 2>}, {transform_indices = @transform_1, window_bounds = array<i64: 16, 100>}, {transform_indices = @transform_2, window_bounds = array<i64: 16, 100>}, {transform_indices = @transform_3, window_bounds = array<i64: 1, 1>}]} {
    %c0 = arith.constant 0 : index
    %0 = memref.load %arg1[%c0] : memref<2xf32, #tpu.memory_space<smem>>
    %c1 = arith.constant 1 : index
    %1 = memref.load %arg1[%c1] : memref<2xf32, #tpu.memory_space<smem>>
    %c0_0 = arith.constant 0 : index
    %c0_1 = arith.constant 0 : index
    %2 = vector.load %arg2[%c0_0, %c0_1] : memref<16x100xf32, #tpu.memory_space<vmem>>, vector<16x100xf32>
    %c0_2 = arith.constant 0 : index
    %c0_3 = arith.constant 0 : index
    %3 = vector.load %arg3[%c0_2, %c0_3] : memref<16x100xf32, #tpu.memory_space<vmem>>, vector<16x100xf32>
    %cst = arith.constant dense<0xFF800000> : vector<16xf32>
    %4 = vector.multi_reduction <maximumf>, %2, %cst [1] : vector<16x100xf32> to vector<16xf32>
    %5 = vector.shape_cast %4 : vector<16xf32> to vector<16x1xf32>
    %6 = vector.broadcast %5 : vector<16x1xf32> to vector<16x100xf32>
    %7 = arith.subf %2, %6 : vector<16x100xf32>
    %8 = vector.broadcast %0 : f32 to vector<16x100xf32>
    %9 = arith.mulf %7, %8 : vector<16x100xf32>
    %10 = math.exp %9 : vector<16x100xf32>
    %cst_4 = arith.constant dense<0.000000e+00> : vector<16xf32>
    %11 = vector.multi_reduction <add>, %10, %cst_4 [1] : vector<16x100xf32> to vector<16xf32>
    %12 = vector.shape_cast %11 : vector<16xf32> to vector<16x1xf32>
    %cst_5 = arith.constant dense<0xFF800000> : vector<16xf32>
    %13 = vector.multi_reduction <maximumf>, %3, %cst_5 [1] : vector<16x100xf32> to vector<16xf32>
    %14 = vector.shape_cast %13 : vector<16xf32> to vector<16x1xf32>
    %15 = vector.broadcast %14 : vector<16x1xf32> to vector<16x100xf32>
    %16 = arith.subf %3, %15 : vector<16x100xf32>
    %17 = vector.broadcast %0 : f32 to vector<16x100xf32>
    %18 = arith.mulf %16, %17 : vector<16x100xf32>
    %19 = math.exp %18 : vector<16x100xf32>
    %cst_6 = arith.constant dense<0.000000e+00> : vector<16xf32>
    %20 = vector.multi_reduction <add>, %19, %cst_6 [1] : vector<16x100xf32> to vector<16xf32>
    %21 = vector.shape_cast %20 : vector<16xf32> to vector<16x1xf32>
    %22 = arith.subf %18, %9 : vector<16x100xf32>
    %23 = arith.mulf %19, %22 : vector<16x100xf32>
    %cst_7 = arith.constant dense<0.000000e+00> : vector<16xf32>
    %24 = vector.multi_reduction <add>, %23, %cst_7 [1] : vector<16x100xf32> to vector<16xf32>
    %25 = vector.shape_cast %24 : vector<16xf32> to vector<16x1xf32>
    %26 = tpu.reciprocal %21 : vector<16x1xf32> -> vector<16x1xf32>
    %27 = arith.mulf %25, %26 : vector<16x1xf32>
    %28 = math.log %12 : vector<16x1xf32>
    %29 = math.log %21 : vector<16x1xf32>
    %30 = arith.subf %28, %29 : vector<16x1xf32>
    %31 = arith.addf %27, %30 : vector<16x1xf32>
    %c0_i32 = arith.constant 0 : i32
    %32 = arith.cmpi eq, %arg0, %c0_i32 : i32
    %33 = arith.extui %32 : i1 to i32
    %c0_i32_8 = arith.constant 0 : i32
    %34 = arith.cmpi ne, %33, %c0_i32_8 : i32
    scf.if %34 {
      %cst_15 = arith.constant 0.000000e+00 : f32
      %41 = vector.broadcast %cst_15 : f32 to vector<16x1xf32>
      %c0_16 = arith.constant 0 : index
      %c0_17 = arith.constant 0 : index
      %42 = vector.load %arg5[%c0_16, %c0_17] : memref<16x1xf32, #tpu.memory_space<vmem>>, vector<16x1xf32>
      tpu.vector_store %arg5[%c0_16, %c0_17], %41 {strides = array<i32>} : memref<16x1xf32, #tpu.memory_space<vmem>>, vector<16x1xf32>,
    } else {
    }
    %c0_9 = arith.constant 0 : index
    %c0_10 = arith.constant 0 : index
    %35 = vector.load %arg5[%c0_9, %c0_10] : memref<16x1xf32, #tpu.memory_space<vmem>>, vector<16x1xf32>
    %36 = arith.addf %35, %31 : vector<16x1xf32>
    %c0_11 = arith.constant 0 : index
    %c0_12 = arith.constant 0 : index
    %37 = vector.load %arg5[%c0_11, %c0_12] : memref<16x1xf32, #tpu.memory_space<vmem>>, vector<16x1xf32>
    tpu.vector_store %arg5[%c0_11, %c0_12], %36 {strides = array<i32>} : memref<16x1xf32, #tpu.memory_space<vmem>>, vector<16x1xf32>,
    %c0_i32_13 = arith.constant 0 : i32
    %38 = arith.cmpi eq, %arg0, %c0_i32_13 : i32
    %39 = arith.extui %38 : i1 to i32
    %c0_i32_14 = arith.constant 0 : i32
    %40 = arith.cmpi ne, %39, %c0_i32_14 : i32
    scf.if %40 {
      %c0_15 = arith.constant 0 : index
      %c0_16 = arith.constant 0 : index
      %41 = vector.load %arg5[%c0_15, %c0_16] : memref<16x1xf32, #tpu.memory_space<vmem>>, vector<16x1xf32>
      %42 = vector.shape_cast %41 : vector<16x1xf32> to vector<1x16x1xf32>
      %cst_17 = arith.constant dense<0.000000e+00> : vector<1xf32>
      %43 = vector.multi_reduction <add>, %42, %cst_17 [1, 2] : vector<1x16x1xf32> to vector<1xf32>
      %44 = vector.shape_cast %43 : vector<1xf32> to vector<1x1x1xf32>
      %45 = vector.extract %44[0, 0, 0] : f32 from vector<1x1x1xf32>
      %46 = arith.mulf %45, %1 : f32
      %c0_18 = arith.constant 0 : index
      %c0_19 = arith.constant 0 : index
      %47 = memref.load %arg4[%c0_18, %c0_19] : memref<1x1xf32, #tpu.memory_space<smem>>
      memref.store %46, %arg4[%c0_18, %c0_19] : memref<1x1xf32, #tpu.memory_space<smem>>
    } else {
    }
    return
  }
  func.func @transform_0(%arg0: i32) -> i32 {
    %c0_i32 = arith.constant 0 : i32
    %c0_i32_0 = arith.constant 0 : i32
    return %c0_i32 : i32
  }
  func.func @transform_1(%arg0: i32) -> (i32, i32) {
    %c0_i32 = arith.constant 0 : i32
    %c0_i32_0 = arith.constant 0 : i32
    return %arg0, %c0_i32 : i32, i32
  }
  func.func @transform_2(%arg0: i32) -> (i32, i32) {
    %c0_i32 = arith.constant 0 : i32
    %c0_i32_0 = arith.constant 0 : i32
    return %arg0, %c0_i32 : i32, i32
  }
  func.func @transform_3(%arg0: i32) -> (i32, i32) {
    %c0_i32 = arith.constant 0 : i32
    %c0_i32_0 = arith.constant 0 : i32
    %c0_i32_1 = arith.constant 0 : i32
    return %c0_i32, %c0_i32_0 : i32, i32
  }
}

</mosaic_0001>

<bundles_post_ra>
// kernel: tpu_custom_call.1
= control target key start
LH: loop header
LB: loop body
LE: loop exit
PB: predicated region body
PF: predicated region fallthrough
CT: control target
= control target key end

     0   :  { %8 = vsyncpa [#allocation5], 0  ;;  %s377_s0 = inlined_call_operand.hbm [shape: f32[2], index: 0, kind: input, shape index: {}]   ;;  %s378_s1 = inlined_call_operand.hbm [shape: f32[16,100], index: 1, kind: input, shape index: {}]   ;;  %s379_s2 = inlined_call_operand.hbm [shape: f32[16,100], index: 2, kind: input, shape index: {}]   ;;  %s380_s3 = inlined_call_operand.hbm [shape: f32[1,1], index: 3, kind: output, shape index: {}]  }
   0x1   :  { %9 = vsyncpa [#allocation4], 0 }
   0x2   :  { %10 = vsyncpa [#allocation9], 0 }
   0x3   :  { %11 = vsyncpa [#allocation6], 0  ;;  %s17_s14 = sshll.u32 %s377_s0, 4  ;;  %s25_s17 = sshll.u32 %s378_s1, 4  ;;  %s18_s14 = int_to_ptr.hbm [resolvable:$true] %s17_s14  ;;  %s26_s17 = int_to_ptr.hbm [resolvable:$true] %s25_s17 }
   0x4   :  { %s322_s18 = smov [#allocation3]   ;;  %s323_s19 = smov [#allocation7]  }
   0x5   :  { %20 = dma.hbm_to_smem %s18_s14, 16, %s322_s18, [#allocation5]  }
   0x6   :  { %s27_s20 = sshll.u32 %s323_s19, 4  ;;  %s324_s21 = smov 128   ;;  %s28_s20 = int_to_ptr.vmem [resolvable:$true] %s27_s20 }
   0x7   :  { %s325_s22 = smov 8   ;;  %s38_s25 = sshll.u32 %s379_s2, 4  ;;  %s39_s25 = int_to_ptr.hbm [resolvable:$true] %s38_s25 }
   0x8   :  { %33 = dma.hbm_to_vmem [thread:$0]  %s26_s17, 256, %s28_s20, [#allocation4], %s324_s21, %s324_s21, %s325_s22  }
   0x9   :  { %s326_s0 = smov [#allocation8]  }
   0xa   :  { %s40_s26 = sshll.u32 %s326_s0, 4  ;;  %s41_s26 = int_to_ptr.vmem [resolvable:$true] %s40_s26 }
   0xb   :  { %46 = dma.hbm_to_vmem [thread:$0]  %s39_s25, 256, %s41_s26, [#allocation9], %s324_s21, %s324_s21, %s325_s22  }
   0xc   :  { %314 = dma.done.wait [#allocation5], 16  }
   0xd   :  { %315 = vsyncadd [#allocation5], 4294967280 }
   0xe   :  { %316 = dma.done.wait [#allocation4], 256  }
   0xf   :  { %317 = vsyncadd [#allocation4], 4294967040 }
  0x10   :  { %318 = dma.done.wait [#allocation9], 256  }
  0x11   :  { %319 = vsyncadd [#allocation9], 4294967040 }
  0x12   :  { %59 = sfence }
  0x13   :  { %v64_v0 = vld [vmem:[#allocation8] sm:$0xff]  ;;  %vm66_vm0 = vcmask 818176   ;;  %v62_v1 = vld [vmem:[#allocation7] sm:$0xff]  ;;  %v65_v4 = vld [vmem:[#allocation8 + $0x8] sm:$0xff]  ;;  %s60_s1 = sld [smem:[#allocation3]]  ;;  %vm164_vm1 = vcmask 7168  }
  0x14   :  { %v88_v2 = vsel %vm66_vm0, %v64_v0, -inf  ;;  %v67_v3 = vsel %vm66_vm0, %v62_v1, -inf  ;;  %v63_v5 = vld [vmem:[#allocation7 + $0x8] sm:$0xff]  ;;  %v91_v6 = vsel %vm66_vm0, %v65_v4, -inf  ;;  %v327_v39 = vmov 0.0   ;;  %s212_s2 = sld [smem:[#allocation3 + $0x1]] }
  0x15   :  { %89 = vmax.xlane.f32.xlu0 %v88_v2  ;;  %68 = vmax.xlane.f32.xlu1 %v67_v3  ;;  %v70_v7 = vsel %vm66_vm0, %v63_v5, -inf  ;;  %166 = vst.msk [vmem:[#allocation2 + $0x8] sm:$0xff] %vm164_vm1, %v327_v39  ;;  %s199_s29 = sshll.u32 %s380_s3, 4  ;;  %s328_s5 = smov [#allocation10]   ;;  %s200_s29 = int_to_ptr.hbm [resolvable:$true] %s199_s29 }
  0x16   :  { %165 = vst.msk [vmem:[#allocation2] sm:$0xff] %vm164_vm1, %v327_v39 }
  0x19   :  { %v75_v9 = vstv %s60_s1 }
  0x1d   :  { %92 = vmax.xlane.f32.xlu0 %v91_v6  ;;  %71 = vmax.xlane.f32.xlu1 %v70_v7  ;;  %v167_v3 = vld [vmem:[#allocation2] sm:$0xff] }
  0x88   :  { %v90_v8 = vpop.xlane.xlu0 %89  ;;  %v69_v10 = vpop.xlane.xlu1 %68 }
  0x89   :  { %v94_v11 = vsub.f32 %v64_v0, %v90_v8  ;;  %v73_v12 = vsub.f32 %v62_v1, %v69_v10 }
  0x8b   :  { %v96_v13 = vmul.f32 %v94_v11, %v75_v9  ;;  %v76_v14 = vmul.f32 %v75_v9, %v73_v12 }
  0x8d   :  { %v98_v15 = vmul.f32 1.442695, %v96_v13  ;;  %v78_v16 = vmul.f32 1.442695, %v76_v14  ;;  %v108_v36 = vsub.f32 %v96_v13, %v76_v14 }
  0x8f   :  { %222 = vpow2.f32 %v98_v15 }
  0x90   :  { %224 = vpow2.f32 %v78_v16  ;;  %v93_v17 = vpop.xlane.xlu0 %92  ;;  %v72_v18 = vpop.xlane.xlu1 %71 }
  0x91   :  { %v95_v19 = vsub.f32 %v65_v4, %v93_v17  ;;  %v74_v20 = vsub.f32 %v63_v5, %v72_v18  ;;  %v168_v17 = vld [vmem:[#allocation2 + $0x8] sm:$0xff] }
  0x93   :  { %v97_v21 = vmul.f32 %v95_v19, %v75_v9  ;;  %v77_v22 = vmul.f32 %v75_v9, %v74_v20 }
  0x95   :  { %v223_v23 = vpop.eup %222  ;;  %v100_v24 = vmul.f32 1.442695, %v97_v21  ;;  %v80_v25 = vmul.f32 1.442695, %v77_v22  ;;  %v109_v29 = vsub.f32 %v97_v21, %v77_v22 }
  0x96   :  { %v225_v26 = vpop.eup %224  ;;  %v102_v27 = vsel %vm66_vm0, %v223_v23, 0.0  ;;  %v110_v37 = vmul.f32 %v223_v23, %v108_v36 }
  0x97   :  { %226 = vpow2.f32 %v100_v24  ;;  %103 = vadd.xlane.f32.xlu2 %v102_v27  ;;  %v82_v28 = vsel %vm66_vm0, %v225_v26, 0.0 }
  0x98   :  { %228 = vpow2.f32 %v80_v25  ;;  %83 = vadd.xlane.f32.xlu0 %v82_v28  ;;  %v112_v38 = vsel %vm66_vm0, %v110_v37, 0.0 }
  0x9d   :  { %v227_v30 = vpop.eup %226 }
  0x9e   :  { %v229_v31 = vpop.eup %228  ;;  %v105_v32 = vsel %vm66_vm0, %v227_v30, 0.0  ;;  %v111_v33 = vmul.f32 %v227_v30, %v109_v29 }
  0x9f   :  { %106 = vadd.xlane.f32.xlu2 %v105_v32  ;;  %v85_v34 = vsel %vm66_vm0, %v229_v31, 0.0 }
  0xa0   :  { %86 = vadd.xlane.f32.xlu1 %v85_v34  ;;  %v115_v35 = vsel %vm66_vm0, %v111_v33, 0.0 }
  0xa1   :  { %116 = vadd.xlane.f32.xlu0 %v115_v35 }
  0xa7   :  { %113 = vadd.xlane.f32.xlu2 %v112_v38 }
 0x10a   :  { %v104_v40 = vpop.xlane.xlu2 %103 }
 0x10b   :  { %230 = vrcp.f32 %v104_v40  ;;  %v84_v41 = vpop.xlane.xlu0 %83  ;;  %v129_v49 = vand.u32 2147483648, %v104_v40  ;;  %v127_v51 = vand.u32 2147483647, %v104_v40  ;;  %vm123_vm3 = vweird.f32 %v104_v40 }
 0x10c   :  { %232 = vlog2.f32 %v104_v40 }
 0x10d   :  { %234 = vlog2.f32 %v84_v41  ;;  %v130_v56 = vor.u32 1.1754944e-38, %v129_v49  ;;  %vm128_vm5 = vcmp.eq.f32.partialorder %v127_v51, 8.507059e+37 }
 0x111   :  { %v231_v42 = vpop.eup %230 }
 0x112   :  { %v119_v43 = vmul.f32 %v231_v42, %v104_v40  ;;  %v107_v44 = vpop.xlane.xlu2 %106  ;;  %v233_v45 = vpop.eup %232  ;;  %vm124_vm2 = vweird.f32 %v231_v42 }
 0x113   :  { %236 = vrcp.f32 %v107_v44  ;;  %v87_v46 = vpop.xlane.xlu1 %86  ;;  %v235_v48 = vpop.eup %234  ;;  %v153_v52 = vmul.f32 0.6931472, %v233_v45  ;;  %vm125_vm4 = vmor %vm123_vm3, %vm124_vm2  ;;  %v143_v2 = vand.u32 2147483648, %v107_v44  ;;  %v141_v5 = vand.u32 2147483647, %v107_v44 }
 0x114   :  { %v120_v47 = vsub.f32 1.0, %v119_v43  ;;  %238 = vlog2.f32 %v107_v44  ;;  %v149_v53 = vmul.f32 0.6931472, %v235_v48  ;;  %vm137_vm7 = vweird.f32 %v107_v44  ;;  %v117_v14 = vpop.xlane.xlu0 %116 }
 0x115   :  { %240 = vlog2.f32 %v87_v46  ;;  %v144_v11 = vor.u32 1.1754944e-38, %v143_v2  ;;  %vm142_vm9 = vcmp.eq.f32.partialorder %v141_v5, 8.507059e+37 }
 0x116   :  { %v121_v50 = vmul.f32 %v231_v42, %v120_v47  ;;  %v156_v62 = vsub.f32 %v149_v53, %v153_v52 }
 0x118   :  { %v122_v54 = vadd.f32 %v231_v42, %v121_v50 }
 0x119   :  { %v237_v55 = vpop.eup %236 }
 0x11a   :  { %v133_v57 = vmul.f32 %v237_v55, %v107_v44  ;;  %v126_v58 = vsel %vm125_vm4, %v231_v42, %v122_v54  ;;  %v114_v59 = vpop.xlane.xlu2 %113  ;;  %v239_v61 = vpop.eup %238  ;;  %vm138_vm6 = vweird.f32 %v237_v55 }
 0x11b   :  { %v131_v60 = vsel %vm128_vm5, %v130_v56, %v126_v58  ;;  %v241_v1 = vpop.eup %240  ;;  %v155_v7 = vmul.f32 0.6931472, %v239_v61  ;;  %vm139_vm8 = vmor %vm137_vm7, %vm138_vm6 }
 0x11c   :  { %v134_v63 = vsub.f32 1.0, %v133_v57  ;;  %v146_v0 = vmul.f32 %v131_v60, %v114_v59  ;;  %v151_v8 = vmul.f32 0.6931472, %v241_v1 }
 0x11e   :  { %v135_v4 = vmul.f32 %v237_v55, %v134_v63  ;;  %v158_v6 = vadd.f32 %v156_v62, %v146_v0  ;;  %v157_v15 = vsub.f32 %v151_v8, %v155_v7 }
 0x120   :  { %v136_v9 = vadd.f32 %v237_v55, %v135_v4  ;;  %v169_v10 = vadd.f32 %v167_v3, %v158_v6 }
 0x122   :  { %v140_v12 = vsel %vm139_vm8, %v237_v55, %v136_v9  ;;  %172 = vst.msk [vmem:[#allocation2] sm:$0xff] %vm164_vm1, %v169_v10 }
 0x123   :  { %v145_v13 = vsel %vm142_vm9, %v144_v11, %v140_v12 }
 0x124   :  { %v147_v16 = vmul.f32 %v145_v13, %v117_v14 }
 0x126   :  { %v159_v18 = vadd.f32 %v157_v15, %v147_v16 }
 0x128   :  { %v170_v19 = vadd.f32 %v168_v17, %v159_v18 }
 0x129   :  { %v177_v20 = vld [vmem:[#allocation2] sm:$0xff] }
 0x12a   :  { %173 = vst.msk [vmem:[#allocation2 + $0x8] sm:$0xff] %vm164_vm1, %v170_v19  ;;  %v179_v22 = vsel %vm164_vm1, %v177_v20, 0.0 }
 0x131   :  { %v178_v21 = vld [vmem:[#allocation2 + $0x8] sm:$0xff] }
 0x132   :  { %v180_v23 = vsel %vm164_vm1, %v178_v21, 0.0 }
 0x133   :  { %v181_v24 = vadd.f32 %v180_v23, %v179_v22 }
 0x135   :  { %182 = vadd.xlane.f32.xlu1 %v181_v24 }
 0x1a8   :  { %v183_v25 = vpop.xlane.xlu1 %182 }
 0x1a9   :  { %v184_v26 = vrot.slane %v183_v25, 4 }
 0x1ab   :  { %v185_v27 = vadd.f32 %v184_v26, %v183_v25 }
 0x1ad   :  { %v186_v28 = vrot.slane %v185_v27, 2 }
 0x1af   :  { %v187_v29 = vadd.f32 %v186_v28, %v185_v27 }
 0x1b1   :  { %v188_v30 = vrot.slane %v187_v29, 1 }
 0x1b3   :  { %v189_v31 = vadd.f32 %v188_v30, %v187_v29 }
 0x1b5   :  { %213 = vpush %v189_v31 }
 0x1e6   :  { %s214_s30 = spop %213 }
 0x1e7   :  { %s191_s4 = smul.f32 %s214_s30, %s212_s2 }
 0x1e9   :  { %193 = sst [smem:[#allocation10]] %s191_s4 }
 0x1ea   :  { %202 = dma.smem_to_hbm %s328_s5, 16, %s200_s29, [#allocation6]  }
 0x1eb   :  { %320 = dma.done.wait [#allocation6], 16  }
 0x1ec   :  { %321 = vsyncadd [#allocation6], 4294967280 }
 0x1ed   :  { %207 = sfence }
 0x1ee   :  { %208 = vsyncpa [#allocation4], 1 }
 0x1ef   :  { %209 = vsyncpa [#allocation9], 1 }
 0x1f0   :  { %210 = vsyncpa [#allocation5], 1 }
 0x1f1   :  { %211 = vsyncpa [#allocation6], 1 }

</bundles_post_ra>
